<compile_context>
chip_gen: v7x
topology: tpu7x:2x2x1
jax: 0.10.0
libtpu: 0.0.40
codegen_flags: <defaults>
</compile_context>

<pallas_src>
import functools

import jax
import jax.numpy as jnp
import numpy as np
from jax import lax
from jax.experimental import pallas as pl
from jax.experimental.pallas import tpu as pltpu


# ----------------------------------------------------------------------------
# Helpers
# ----------------------------------------------------------------------------
def _round_up(x, m):
    return ((x + m - 1) // m) * m


def _sublane_granule(dtype):
    # f32 -> 8, bf16 -> 16, int8/fp8 -> 32 (sub-32-bit packs along sublanes).
    return max(8, 32 // jnp.dtype(dtype).itemsize)


def _tpu_target_and_vmem():
    """(target tile bytes, physical VMEM bytes) — generation aware, safe fallback."""
    vmem_cap = 64 << 20           # conservative fallback (v7x per-TC VMEM)
    try:
        info = pltpu.get_tpu_info()
        cap = getattr(info, "vmem_capacity_bytes", None)
        if cap:
            vmem_cap = int(cap)
    except Exception:
        pass
    kind = ""
    try:
        kind = jax.devices()[0].device_kind.lower()
    except Exception:
        pass
    if "v7" in kind:
        target = 16 << 20         # ~3.2 TB/s HBM: amortize the per-step overhead
    elif "v6" in kind:
        target = 8 << 20
    else:
        target = 4 << 20          # v5e (and unknown): roofline saturates by ~4 MiB
    return target, vmem_cap


# ----------------------------------------------------------------------------
# Pallas kernel: chunked spatial reduction + fused channel gate
# ----------------------------------------------------------------------------
def _gct_kernel(x_ref, params_ref, o_ref, *, epsilon, mode, after_relu, hw, chunk):
    # x_ref:      (TB, C, HW) tile of the input
    # params_ref: (3, C)  rows = alpha, gamma, beta (float32)
    # o_ref:      (TB, C)  gate values for this batch tile
    TB, C = o_ref.shape

    def chunk_reduce(idx):
        # Cast/square only one chunk at a time: keeps live fp32 state to a
        # single (TB, C) accumulator instead of full-tile temporaries.
        xc = x_ref[:, :, idx].astype(jnp.float32)            # (TB, C, chunk)
        if mode == 'l2':
            return jnp.sum(xc * xc, axis=-1)                  # (TB, C)
        elif mode == 'l1':
            xin = xc if after_relu else jnp.abs(xc)
            return jnp.sum(xin, axis=-1)                      # (TB, C)
        else:
            raise ValueError("Unknown mode: " + str(mode))

    if hw <= chunk:
        acc = chunk_reduce(slice(None))                       # single shot
    else:
        n_full = hw // chunk
        rem = hw - n_full * chunk

        def body(i, acc):
            start = pl.multiple_of(i * chunk, chunk)          # aligned lane loads
            return acc + chunk_reduce(pl.ds(start, chunk))

        acc = lax.fori_loop(0, n_full, body,
                            jnp.zeros((TB, C), jnp.float32),
                            unroll=True if n_full <= 8 else 4)
        if rem > 0:
            acc = acc + chunk_reduce(slice(n_full * chunk, hw))

    params = params_ref[...].astype(jnp.float32)              # (3, C)
    alpha = params[0:1, :]
    gamma = params[1:2, :]
    beta = params[2:3, :]

    if mode == 'l2':
        embedding = jnp.sqrt(acc + epsilon) * alpha                          # (TB, C)
        mean = jnp.mean(embedding * embedding, axis=-1, keepdims=True)       # (TB, 1)
        norm = gamma * lax.rsqrt(mean + epsilon)                             # (TB, C)
    else:  # 'l1'
        embedding = acc * alpha                                              # (TB, C)
        mean = jnp.mean(jnp.abs(embedding), axis=-1, keepdims=True)          # (TB, 1)
        norm = gamma / (mean + epsilon)                                      # (TB, C)

    gate = 1.0 + jnp.tanh(embedding * norm + beta)                           # (TB, C)
    o_ref[...] = gate.astype(o_ref.dtype)


# ----------------------------------------------------------------------------
# Wrapper
# ----------------------------------------------------------------------------
def gct_forward(x, alpha, gamma, beta, *, epsilon=1e-5, mode='l2',
                after_relu=False, batch_tile=None, chunk=512):
    """x: (N, C, H, W); alpha/gamma/beta: (1, C, 1, 1). Returns gate (N, C, 1, 1)."""
    assert x.ndim == 4
    N, C, H, W = x.shape
    HW = H * W

    x2 = x.reshape(N, C, HW)
    # One (3, C) fp32 parameter operand instead of three tiny ones.
    params = jnp.concatenate(
        [alpha.reshape(1, C), gamma.reshape(1, C), beta.reshape(1, C)],
        axis=0).astype(jnp.float32)

    itemsize = jnp.dtype(x.dtype).itemsize
    granule = _sublane_granule(x.dtype)          # out dtype == x dtype

    # Real VMEM footprint of one sample's (C, HW) slab after (8,128) padding.
    padded_c = _round_up(C, granule)
    padded_hw = _round_up(HW, 128)
    per_sample = padded_c * padded_hw * itemsize

    target_bytes, vmem_cap = _tpu_target_and_vmem()
    budget = int(0.8 * vmem_cap)                 # never ask for > ~80% of physical VMEM

    if batch_tile is None:
        tb = max(1, target_bytes // per_sample)
        # Keep the double-buffered input tile well inside the budget.
        tb = min(tb, max(1, (budget // 2) // (2 * per_sample)))
        tb = min(tb, N)
    else:
        tb = max(1, min(int(batch_tile), N))
    # Sublane-align TB unless it covers the whole batch (unmasked vst stores).
    if tb < N:
        tb = max(granule, (tb // granule) * granule)
        if tb >= N:
            tb = N
    TB = int(tb)
    grid = (int(pl.cdiv(N, TB)),)

    # VMEM accounting with padding: 2x input tile (double buffered) + 2x output
    # tile + params + small f32 working set + headroom; clamp into the budget.
    x_tile = TB * padded_c * padded_hw * itemsize
    out_tile = _round_up(TB, 8) * _round_up(C, 128) * itemsize
    work = 4 * TB * _round_up(C, 128) * 4
    vmem_bytes = 2 * x_tile + 2 * out_tile + 3 * _round_up(C, 128) * 4 + work + (2 << 20)
    vmem_limit = int(min(budget, max(16 << 20, int(vmem_bytes * 1.25))))

    kernel = functools.partial(_gct_kernel, epsilon=epsilon, mode=mode,
                               after_relu=after_relu, hw=HW, chunk=int(chunk))

    n_transc = (3 if mode == 'l2' else 1) * N * C
    cost = pl.CostEstimate(
        flops=2 * N * C * HW,
        transcendentals=n_transc,
        bytes_accessed=N * C * HW * itemsize + N * C * itemsize + 3 * C * 4,
    )

    out = pl.pallas_call(
        kernel,
        out_shape=jax.ShapeDtypeStruct((N, C), x.dtype),
        grid_spec=pltpu.PrefetchScalarGridSpec(
            num_scalar_prefetch=0,
            grid=grid,
            in_specs=[
                pl.BlockSpec((TB, C, HW), lambda b: (b, 0, 0)),
                pl.BlockSpec((3, C), lambda b: (0, 0)),
            ],
            out_specs=pl.BlockSpec((TB, C), lambda b: (b, 0)),
        ),
        compiler_params=pltpu.CompilerParams(
            dimension_semantics=("parallel",),
            vmem_limit_bytes=vmem_limit,
        ),
        cost_estimate=cost,
    )(x2, params)

    return out.reshape(N, C, 1, 1)


# ----------------------------------------------------------------------------
# Plain-JAX reference (mirrors the PyTorch forward)
# ----------------------------------------------------------------------------
def gct_ref(x, alpha, gamma, beta, epsilon=1e-5, mode='l2', after_relu=False):
    if mode == 'l2':
        embedding = jnp.sqrt(jnp.sum(x * x, axis=(2, 3), keepdims=True) + epsilon) * alpha
        norm = gamma / jnp.sqrt(jnp.mean(embedding * embedding, axis=1, keepdims=True) + epsilon)
    elif mode == 'l1':
        _x = x if after_relu else jnp.abs(x)
        embedding = jnp.sum(_x, axis=(2, 3), keepdims=True) * alpha
        norm = gamma / (jnp.mean(jnp.abs(embedding), axis=1, keepdims=True) + epsilon)
    else:
        raise ValueError(mode)
    return 1.0 + jnp.tanh(embedding * norm + beta)


# ----------------------------------------------------------------------------
# Demo / self-test
# ----------------------------------------------------------------------------
if __name__ == "__main__":
    N, C, H, W = 2, 4, 16, 16

    key = jax.random.PRNGKey(0)
    kx, ka, kg, kb = jax.random.split(key, 4)
    x = jax.random.normal(kx, (N, C, H, W), dtype=jnp.float32)

    # Random (non-degenerate) parameters for a meaningful numerical check;
    # the module defaults (alpha=1, gamma=0, beta=0) give gate==1 trivially.
    alpha = 1.0 + 0.1 * jax.random.normal(ka, (1, C, 1, 1), dtype=jnp.float32)
    gamma = 0.5 * jax.random.normal(kg, (1, C, 1, 1), dtype=jnp.float32)
    beta = 0.1 * jax.random.normal(kb, (1, C, 1, 1), dtype=jnp.float32)

    # l2 mode (module default)
    gate = gct_forward(x, alpha, gamma, beta, epsilon=1e-5, mode='l2')
    gate = jax.block_until_ready(gate)
    ref = gct_ref(x, alpha, gamma, beta, epsilon=1e-5, mode='l2')
    assert gate.shape == (N, C, 1, 1)
    np.testing.assert_allclose(np.asarray(gate), np.asarray(ref),
                               rtol=1e-5, atol=1e-5)

    # l1 mode sanity check as well
    gate_l1 = gct_forward(x, alpha, gamma, beta, epsilon=1e-5, mode='l1',
                          after_relu=False)
    gate_l1 = jax.block_until_ready(gate_l1)
    ref_l1 = gct_ref(x, alpha, gamma, beta, epsilon=1e-5, mode='l1',
                     after_relu=False)
    np.testing.assert_allclose(np.asarray(gate_l1), np.asarray(ref_l1),
                               rtol=1e-5, atol=1e-5)

    # Exercise the chunked-accumulation + aligned-TB path (HW > chunk, N > TB).
    N2, C2, H2, W2 = 24, 8, 24, 24
    x2 = jax.random.normal(kx, (N2, C2, H2, W2), dtype=jnp.float32)
    a2 = 1.0 + 0.1 * jax.random.normal(ka, (1, C2, 1, 1), dtype=jnp.float32)
    g2 = 0.5 * jax.random.normal(kg, (1, C2, 1, 1), dtype=jnp.float32)
    b2 = 0.1 * jax.random.normal(kb, (1, C2, 1, 1), dtype=jnp.float32)
    gate2 = gct_forward(x2, a2, g2, b2, epsilon=1e-5, mode='l2',
                        batch_tile=10, chunk=256)
    gate2 = jax.block_until_ready(gate2)
    ref2 = gct_ref(x2, a2, g2, b2, epsilon=1e-5, mode='l2')
    np.testing.assert_allclose(np.asarray(gate2), np.asarray(ref2),
                               rtol=1e-5, atol=1e-5)

    print("KERNEL_OK")
</pallas_src>

<mosaic_0001>
module attributes {stable_mosaic.version = 11 : i64} {
  func.func @_gct_kernel(%arg0: i32, %arg1: memref<2x4x256xf32, #tpu.memory_space<vmem>>, %arg2: memref<3x4xf32, #tpu.memory_space<vmem>>, %arg3: memref<2x4xf32, #tpu.memory_space<vmem>>) attributes {dimension_semantics = [#tpu.dimension_semantics<parallel>], iteration_bounds = array<i64: 1>, scalar_prefetch = 0 : i64, scratch_operands = 0 : i64, tpu.core_type = #tpu.core_type<tc>, window_params = [{transform_indices = @transform_0, window_bounds = array<i64: 2, 4, 256>}, {pipeline_mode = #tpu.pipeline_mode<synchronous>, transform_indices = @transform_1, window_bounds = array<i64: 3, 4>}, {transform_indices = @transform_2, window_bounds = array<i64: 2, 4>}]} {
    %c0 = arith.constant 0 : index
    %c0_0 = arith.constant 0 : index
    %c0_1 = arith.constant 0 : index
    %0 = vector.load %arg1[%c0, %c0_0, %c0_1] : memref<2x4x256xf32, #tpu.memory_space<vmem>>, vector<2x4x256xf32>
    %1 = arith.mulf %0, %0 : vector<2x4x256xf32>
    %cst = arith.constant dense<0.000000e+00> : vector<2x4xf32>
    %2 = vector.multi_reduction <add>, %1, %cst [2] : vector<2x4x256xf32> to vector<2x4xf32>
    %c0_2 = arith.constant 0 : index
    %c0_3 = arith.constant 0 : index
    %3 = vector.load %arg2[%c0_2, %c0_3] : memref<3x4xf32, #tpu.memory_space<vmem>>, vector<3x4xf32>
    %4 = vector.extract_strided_slice %3 {offsets = [0, 0], sizes = [1, 4], strides = [1, 1]} : vector<3x4xf32> to vector<1x4xf32>
    %5 = vector.extract_strided_slice %3 {offsets = [1, 0], sizes = [1, 4], strides = [1, 1]} : vector<3x4xf32> to vector<1x4xf32>
    %6 = vector.extract_strided_slice %3 {offsets = [2, 0], sizes = [1, 4], strides = [1, 1]} : vector<3x4xf32> to vector<1x4xf32>
    %cst_4 = arith.constant 9.99999974E-6 : f32
    %7 = vector.broadcast %cst_4 : f32 to vector<2x4xf32>
    %8 = arith.addf %2, %7 : vector<2x4xf32>
    %9 = math.sqrt %8 : vector<2x4xf32>
    %10 = vector.broadcast %4 : vector<1x4xf32> to vector<2x4xf32>
    %11 = arith.mulf %9, %10 : vector<2x4xf32>
    %12 = arith.mulf %11, %11 : vector<2x4xf32>
    %cst_5 = arith.constant dense<0.000000e+00> : vector<2xf32>
    %13 = vector.multi_reduction <add>, %12, %cst_5 [1] : vector<2x4xf32> to vector<2xf32>
    %14 = vector.shape_cast %13 : vector<2xf32> to vector<2x1xf32>
    %cst_6 = arith.constant 4.000000e+00 : f32
    %15 = vector.broadcast %cst_6 : f32 to vector<2x1xf32>
    %16 = arith.divf %14, %15 : vector<2x1xf32>
    %cst_7 = arith.constant 9.99999974E-6 : f32
    %17 = vector.broadcast %cst_7 : f32 to vector<2x1xf32>
    %18 = arith.addf %16, %17 : vector<2x1xf32>
    %19 = math.rsqrt %18 : vector<2x1xf32>
    %20 = vector.broadcast %5 : vector<1x4xf32> to vector<2x4xf32>
    %21 = vector.broadcast %19 : vector<2x1xf32> to vector<2x4xf32>
    %22 = arith.mulf %20, %21 : vector<2x4xf32>
    %23 = arith.mulf %11, %22 : vector<2x4xf32>
    %24 = vector.broadcast %6 : vector<1x4xf32> to vector<2x4xf32>
    %25 = arith.addf %23, %24 : vector<2x4xf32>
    %26 = math.tanh %25 : vector<2x4xf32>
    %cst_8 = arith.constant 1.000000e+00 : f32
    %27 = vector.broadcast %cst_8 : f32 to vector<2x4xf32>
    %28 = arith.addf %27, %26 : vector<2x4xf32>
    %c0_9 = arith.constant 0 : index
    %c0_10 = arith.constant 0 : index
    %29 = vector.load %arg3[%c0_9, %c0_10] : memref<2x4xf32, #tpu.memory_space<vmem>>, vector<2x4xf32>
    tpu.vector_store %arg3[%c0_9, %c0_10], %28 {strides = array<i32>} : memref<2x4xf32, #tpu.memory_space<vmem>>, vector<2x4xf32>,
    return
  }
  func.func @transform_0(%arg0: i32) -> (i32, i32, i32) {
    %c0_i32 = arith.constant 0 : i32
    %c0_i32_0 = arith.constant 0 : i32
    %c0_i32_1 = arith.constant 0 : i32
    return %arg0, %c0_i32, %c0_i32_0 : i32, i32, i32
  }
  func.func @transform_1(%arg0: i32) -> (i32, i32) {
    %c0_i32 = arith.constant 0 : i32
    %c0_i32_0 = arith.constant 0 : i32
    %c0_i32_1 = arith.constant 0 : i32
    return %c0_i32, %c0_i32_0 : i32, i32
  }
  func.func @transform_2(%arg0: i32) -> (i32, i32) {
    %c0_i32 = arith.constant 0 : i32
    %c0_i32_0 = arith.constant 0 : i32
    return %arg0, %c0_i32 : i32, i32
  }
}

</mosaic_0001>

<bundles_post_ra>
// kernel: tpu_custom_call.1
= control target key start
LH: loop header
LB: loop body
LE: loop exit
PB: predicated region body
PF: predicated region fallthrough
CT: control target
= control target key end

     0   :  { %7 = vsyncpa [#allocation3], 0  ;;  %s358_s0 = inlined_call_operand.hbm [shape: f32[2,4,256], index: 0, kind: input, shape index: {}]   ;;  %s359_s1 = inlined_call_operand.hbm [shape: f32[3,4], index: 1, kind: input, shape index: {}]   ;;  %s360_s2 = inlined_call_operand.hbm [shape: f32[2,4], index: 2, kind: output, shape index: {}]  }
   0x1   :  { %8 = vsyncpa [#allocation6], 0 }
   0x2   :  { %9 = vsyncpa [#allocation4], 0  ;;  %s282_s9 = smov [#allocation2]   ;;  %s210_s13 = scalar_lea.hbm %s358_s0, 256 }
   0x3   :  { %s15_s10 = sshll.u32 %s282_s9, 4  ;;  %p211_p0 = scmp.ne.s32.totalorder %s358_s0, %s210_s13  ;;  %s16_s10 = int_to_ptr.vmem [resolvable:$true] %s15_s10 }
   0x4   :  { %p214_p1 = scmp.lt.u32.totalorder %s210_s13, %s358_s0 }
   0x6   :  { %p216_p2 = pnand %p214_p1, %p211_p0 }
   0x8   :  { %219 = shalt.err (!%p216_p2)
}
   0x9   :  { %s220_s18 = scalar_lea.vmem %s16_s10, 256  ;;  %p225_p4 = scmp.lt.s32.totalorder %s16_s10, %s16_s10 }
   0xa   :  { %p221_p3 = scmp.ne.s32.totalorder %s16_s10, %s220_s18  ;;  %p226_p5 = scmp.lt.s32.totalorder %s220_s18, %s220_s18 }
   0xc   :  { %p227_p6 = por %p226_p5, %p225_p4 }
   0xe   :  { %p228_p7 = pnand %p227_p6, %p221_p3 }
  0x10   :  { %231 = shalt.err (!%p228_p7)
}
  0x11   :  { %s283_s19 = smov 128   ;;  %s284_s20 = smov 8  }
  0x12   :  { %21 = dma.hbm_to_vmem [thread:$0]  %s358_s0, 256, %s16_s10, [#allocation3], %s283_s19, %s283_s19, %s284_s20  }
  0x13   :  { %s285_s23 = smov [#allocation5]   ;;  %s232_s27 = scalar_lea.hbm %s359_s1, 64 }
  0x14   :  { %s28_s24 = sshll.u32 %s285_s23, 4  ;;  %p233_p8 = scmp.ne.s32.totalorder %s359_s1, %s232_s27  ;;  %s29_s24 = int_to_ptr.vmem [resolvable:$true] %s28_s24 }
  0x15   :  { %p236_p9 = scmp.lt.u32.totalorder %s232_s27, %s359_s1 }
  0x17   :  { %p238_p10 = pnand %p236_p9, %p233_p8 }
  0x19   :  { %241 = shalt.err (!%p238_p10)
}
  0x1a   :  { %s242_s4 = scalar_lea.vmem %s29_s24, 64  ;;  %p247_p12 = scmp.lt.s32.totalorder %s29_s24, %s29_s24 }
  0x1b   :  { %p243_p11 = scmp.ne.s32.totalorder %s29_s24, %s242_s4  ;;  %p248_p13 = scmp.lt.s32.totalorder %s242_s4, %s242_s4 }
  0x1d   :  { %p249_p0 = por %p248_p13, %p247_p12 }
  0x1f   :  { %p250_p1 = pnand %p249_p0, %p243_p11 }
  0x21   :  { %253 = shalt.err (!%p250_p1)
}
  0x22   :  { %31 = dma.hbm_to_vmem [thread:$0]  %s359_s1, 64, %s29_s24, [#allocation6]  }
  0x23   :  { %276 = dma.done.wait [#allocation3], 256  }
  0x24   :  { %277 = vsyncadd [#allocation3], 4294967040 }
  0x25   :  { %278 = dma.done.wait [#allocation6], 64  }
  0x26   :  { %279 = vsyncadd [#allocation6], 4294967232  ;;  %v76_v0 = vlaneseq  ;;  %v38_v3 = vld [vmem:[#allocation2] sm:$0xff]  ;;  %vm48_vm0 = vcmask 1043456   ;;  %v39_v4 = vld [vmem:[#allocation2 + $0x8] sm:$0xff]  ;;  %v286_v17 = vmov 0  }
  0x27   :  { %v330_v5 = vld [vmem:[#allocation5] sm:$0x7]  ;;  %v40_v6 = vmul.f32 %v38_v3, %v38_v3  ;;  %v41_v7 = vmul.f32 %v39_v4, %v39_v4  ;;  %198 = vset.pattern.permute.xlu1 %v286_v17  ;;  %199 = vset.pattern.permute.xlu0 %v286_v17  ;;  %vm107_vm5 = vcmask 1041409   ;;  %vm110_vm6 = vcmask 25600   ;;  %s287_s1 = smov [#allocation7]  }
  0x28   :  { %v327_v1 = vshrl.u32 %v76_v0, 7  ;;  %v98_v37 = vand.u32 127, %v76_v0  ;;  %s182_s6 = sshll.u32 %s287_s1, 4  ;;  %s183_s6 = int_to_ptr.vmem [resolvable:$true] %s182_s6 }
  0x29   :  { %v44_v9 = vcombine.high %v40_v6, %v40_v6  ;;  %v49_v10 = vsel %vm48_vm0, %v40_v6, 0.0  ;;  %v45_v11 = vcombine.high %v41_v7, %v41_v7  ;;  %v54_v13 = vsel %vm48_vm0, %v41_v7, 0.0  ;;  %s254_s7 = scalar_lea.vmem %s183_s6, 32  ;;  %p259_p3 = scmp.lt.s32.totalorder %s183_s6, %s183_s6 }
  0x2a   :  { %v78_v2 = vsub.s32 0, %v327_v1  ;;  %v101_v38 = vsub.s32 %v98_v37, %v327_v1  ;;  %v120_v48 = vsub.s32 1, %v327_v1  ;;  %v144_v52 = vsub.s32 2, %v327_v1  ;;  %p255_p2 = scmp.ne.s32.totalorder %s183_s6, %s254_s7  ;;  %p260_p4 = scmp.lt.s32.totalorder %s254_s7, %s254_s7 }
  0x2b   :  { %v50_v12 = vsel %vm48_vm0, %v44_v9, 0.0  ;;  %v55_v14 = vsel %vm48_vm0, %v45_v11, 0.0 }
  0x2c   :  { %v79_v8 = vrot.slane %v330_v5, %v78_v2  ;;  %v51_v15 = vadd.f32 %v50_v12, %v49_v10  ;;  %v56_v16 = vadd.f32 %v55_v14, %v54_v13  ;;  %v121_v49 = vrot.slane %v330_v5, %v120_v48  ;;  %p261_p5 = por %p260_p4, %p259_p3 }
  0x2d   :  { %v145_v55 = vrot.slane %v330_v5, %v144_v52 }
  0x2e   :  { %82 = vbcast.lane.b32.xlu1 %v79_v8, 256  ;;  %52 = vadd.xlane.f32.xlu0 %v51_v15  ;;  %p262_p6 = pnand %p261_p5, %p255_p2 }
  0x32   :  { %57 = vadd.xlane.f32.xlu0 %v56_v16 }
  0xa0   :  { %v83_v24 = vpop.permute.xlu1 %82 }
  0xbb   :  { %v53_v18 = vpop.xlane.xlu0 %52 }
  0xbc   :  { %v60_v19 = vadd.f32 1e-05, %v53_v18 }
  0xbe   :  { %200 = vrsqrt.f32 %v60_v19  ;;  %vm64_vm1 = vcmp.eq.f32.partialorder %v60_v19, inf  ;;  %v67_v25 = vand.u32 2147483648, %v60_v19  ;;  %vm66_vm2 = vcmp.eq.f32.partialorder %v60_v19, 0.0 }
  0xbf   :  { %v58_v20 = vpop.xlane.xlu0 %57 }
  0xc0   :  { %v61_v21 = vadd.f32 1e-05, %v58_v20 }
  0xc2   :  { %202 = vrsqrt.f32 %v61_v21  ;;  %vm71_vm3 = vcmp.eq.f32.partialorder %v61_v21, inf  ;;  %v74_v31 = vand.u32 2147483648, %v61_v21  ;;  %vm73_vm4 = vcmp.eq.f32.partialorder %v61_v21, 0.0 }
  0xc8   :  { %v201_v22 = vpop.eup %200 }
  0xc9   :  { %v63_v23 = vmul.f32 %v201_v22, %v60_v19 }
  0xcb   :  { %v65_v26 = vsel %vm64_vm1, %v60_v19, %v63_v23 }
  0xcc   :  { %v203_v27 = vpop.eup %202  ;;  %v68_v28 = vsel %vm66_vm2, %v67_v25, %v65_v26 }
  0xcd   :  { %v70_v29 = vmul.f32 %v203_v27, %v61_v21  ;;  %v85_v30 = vmul.f32 %v83_v24, %v68_v28 }
  0xcf   :  { %v72_v32 = vsel %vm71_vm3, %v61_v21, %v70_v29  ;;  %v87_v33 = vmul.f32 %v85_v30, %v85_v30 }
  0xd0   :  { %v75_v34 = vsel %vm73_vm4, %v74_v31, %v72_v32 }
  0xd1   :  { %v86_v35 = vmul.f32 %v83_v24, %v75_v34  ;;  %92 = vperm.xlu1 %198, %v87_v33  }
  0xd3   :  { %v88_v36 = vmul.f32 %v86_v35, %v86_v35 }
  0xd5   :  { %95 = vperm.xlu0 %199, %v88_v36  }
 0x150   :  { %v93_v39 = vpop.permute.xlu1 %92 }
 0x151   :  { %v102_v41 = vrot.slane %v93_v39, %v101_v38 }
 0x154   :  { %v96_v40 = vpop.permute.xlu0 %95 }
 0x155   :  { %v106_v42 = vrot.slane %v96_v40, %v101_v38 }
 0x157   :  { %v108_v43 = vsel %vm107_vm5, %v106_v42, %v102_v41 }
 0x158   :  { %v111_v44 = vsel %vm110_vm6, %v108_v43, 0.0 }
 0x159   :  { %112 = vadd.xlane.f32.xlu1 %v111_v44 }
 0x1e6   :  { %v113_v45 = vpop.xlane.xlu1 %112 }
 0x1e7   :  { %v115_v46 = vmul.f32 0.25, %v113_v45 }
 0x1e9   :  { %v116_v47 = vadd.f32 1e-05, %v115_v46 }
 0x1eb   :  { %204 = vrsqrt.f32 %v116_v47 }
 0x1f5   :  { %v205_v50 = vpop.eup %204 }
 0x1f6   :  { %v122_v51 = vmul.f32 %v205_v50, %v121_v49 }
 0x1f8   :  { %v134_v53 = vrot.slane %v122_v51, %v120_v48  ;;  %v127_v54 = vrot.slane %v122_v51, %v78_v2 }
 0x1fa   :  { %136 = vbcast.lane.b32.xlu0 %v134_v53, 256  ;;  %129 = vbcast.lane.b32.xlu1 %v127_v54, 256 }
 0x1fe   :  { %148 = vbcast.lane.b32.xlu0 %v145_v55, 256 }
 0x26c   :  { %v137_v56 = vpop.permute.xlu0 %136  ;;  %v130_v57 = vpop.permute.xlu1 %129 }
 0x26d   :  { %v141_v58 = vmul.f32 %v137_v56, %v86_v35  ;;  %v140_v59 = vmul.f32 %v130_v57, %v85_v30 }
 0x270   :  { %v149_v60 = vpop.permute.xlu0 %148 }
 0x271   :  { %v151_v61 = vadd.f32 %v149_v60, %v140_v59  ;;  %v152_v62 = vadd.f32 %v149_v60, %v141_v58 }
 0x273   :  { %206 = vtanh.f32 %v151_v61 }
 0x274   :  { %208 = vtanh.f32 %v152_v62 }
 0x27d   :  { %v207_v63 = vpop.eup %206 }
 0x27e   :  { %v209_v0 = vpop.eup %208  ;;  %v155_v3 = vadd.f32 1.0, %v207_v63 }
 0x27f   :  { %v156_v4 = vadd.f32 1.0, %v209_v0 }
 0x280   :  { %160 = vperm.xlu0 %199, %v155_v3  }
 0x281   :  { %163 = vperm.xlu1 %198, %v156_v4  }
 0x2ff   :  { %v161_v1 = vpop.permute.xlu0 %160 }
 0x300   :  { %v168_v2 = vrot.slane %v161_v1, %v101_v38  ;;  %v164_v5 = vpop.permute.xlu1 %163 }
 0x301   :  { %v172_v6 = vrot.slane %v164_v5, %v101_v38 }
 0x303   :  { %v173_v7 = vsel %vm107_vm5, %v172_v6, %v168_v2 }
 0x304   :  { %175 = vst.msk [vmem:[#allocation7] sm:$0x3] %vm110_vm6, %v173_v7 }
 0x305   :  { %265 = shalt.err (!%p262_p6)
}
 0x306   :  { %s266_s10 = scalar_lea.hbm %s360_s2, 32 }
 0x307   :  { %p267_p7 = scmp.ne.s32.totalorder %s360_s2, %s266_s10  ;;  %p270_p8 = scmp.lt.u32.totalorder %s266_s10, %s360_s2 }
 0x309   :  { %p272_p9 = pnand %p270_p8, %p267_p7 }
 0x30b   :  { %275 = shalt.err (!%p272_p9)
}
 0x30c   :  { %185 = dma.vmem_to_hbm [thread:$0]  %s183_s6, 32, %s360_s2, [#allocation4]  }
 0x30d   :  { %280 = dma.done.wait [#allocation4], 32  }
 0x30e   :  { %281 = vsyncadd [#allocation4], 4294967264 }
 0x30f   :  { %189 = vsyncpa [#allocation3], 1 }
 0x310   :  { %190 = vsyncpa [#allocation6], 1 }
 0x311   :  { %191 = vsyncpa [#allocation4], 1 }

</bundles_post_ra>
